<compile_context>
chip_gen: v5e
topology: v5e:2x2
jax: 0.10.0
libtpu: 0.0.40
codegen_flags: <defaults>
</compile_context>

<pallas_src>
import functools

import jax
import jax.numpy as jnp
from jax.experimental import pallas as pl
from jax.experimental.pallas import tpu as pltpu

_MIB = 1024 * 1024


def _round_up(n: int, m: int) -> int:
    return (n + m - 1) // m * m


def _cdiv(a: int, b: int) -> int:
    return (a + b - 1) // b


def _device_kind() -> str:
    try:
        return jax.devices()[0].device_kind.lower()
    except Exception:
        return ""


def _vmem_limit_bytes() -> int:
    """Scoped-VMEM ceiling, clamped to *per-TensorCore* physical capacity."""
    caps = []
    try:
        caps.append(int(pltpu.get_tpu_info().vmem_capacity_bytes))
    except Exception:
        pass
    kind = _device_kind()
    if "7" in kind:                                  # v7x: 64 MiB per TC
        caps.append(64 * _MIB)
    elif any(t in kind for t in ("v4", "v5", "v6")):  # 128 MiB per TC
        caps.append(128 * _MIB)
    else:                                            # unknown: be conservative
        caps.append(64 * _MIB)
    cap = min(caps)
    return max(32 * _MIB, min(cap - 16 * _MIB, 110 * _MIB))


def _tile_targets() -> tuple[int, int]:
    """(tm, tk) targets per generation (review: v6e 1024, v5e/v7x ~512)."""
    kind = _device_kind()
    if "v6" in kind:
        return 1024, 1024
    return 512, 512


def _pick_tk(h4: int, tk_req: int) -> int:
    """Largest 128-multiple divisor of h4 that is <= tk_req (never pad weights)."""
    if h4 % 128 != 0 or h4 <= tk_req:
        return h4
    best = 128
    d = 256
    while d <= tk_req:
        if h4 % d == 0:
            best = d
        d += 128
    return best


def _ffn_kernel(x_ref, wu_ref, bu_ref, wd_ref, bd_ref, g_ref, beta_ref,
                o_ref, acc_ref):
    # x_ref:  (tm, H)        wu_ref: (H, tk)    bu_ref: (1, tk)
    # wd_ref: (tk, H)        bd_ref/g_ref/beta_ref: (1, H)
    # o_ref:  (tm, H)        acc_ref: (tm, H) f32 scratch (resident across k)
    k = pl.program_id(1)

    x = x_ref[...]                                   # native dtype (bf16/f32)

    # up-projection K-slab: MXU in native dtype, f32 accumulation.
    h = jnp.dot(x, wu_ref[...], preferred_element_type=jnp.float32)
    h = h + bu_ref[...].astype(jnp.float32)
    # exact erf GELU (matches torch nn.GELU() default).  A tanh-approx GELU
    # would move the transcendental onto the EUP slot but changes semantics.
    h = 0.5 * h * (1.0 + jax.lax.erf(h * 0.7071067811865476))

    # down-projection K-slab -> resident f32 accumulator.  No zero-fill pass:
    # the first step writes directly, later steps accumulate.
    d = jnp.dot(h.astype(wd_ref.dtype), wd_ref[...],
                preferred_element_type=jnp.float32)

    @pl.when(k == 0)
    def _init():
        acc_ref[...] = d

    @pl.when(k != 0)
    def _accum():
        acc_ref[...] += d

    # TODO(synk): dropout is identity in eval/inference mode; training-mode
    # RNG dropout (pltpu.prng_*) intentionally not applied here.

    @pl.when(k == pl.num_programs(1) - 1)
    def _finalize():
        # residual + single-pass LayerNorm (var = E[y^2] - mean^2) over the
        # hidden (lane) axis, affine, one lane-dense (tm, H) store.
        y = acc_ref[...] + bd_ref[...].astype(jnp.float32) + x.astype(jnp.float32)
        mean = jnp.mean(y, axis=-1, keepdims=True)
        msq = jnp.mean(y * y, axis=-1, keepdims=True)
        var = msq - mean * mean
        yn = (y - mean) * jax.lax.rsqrt(var + 1e-5)
        out = yn * g_ref[...].astype(jnp.float32) + beta_ref[...].astype(jnp.float32)
        o_ref[...] = out.astype(o_ref.dtype)


@functools.partial(jax.jit, static_argnames=("tm", "tk"))
def feed_forward(x, w_up, b_up, w_down, b_down, gamma, beta, *, tm=None, tk=None):
    """x: [B, S, H] -> [B, S, H].  Weights stored [in, out] (vs torch [out, in])."""
    B, S, H = x.shape
    H4 = w_up.shape[1]
    N = B * S
    isz = jnp.dtype(x.dtype).itemsize

    vmem_limit = _vmem_limit_bytes()
    budget = vmem_limit - 5 * _MIB

    tm_t, tk_t = _tile_targets()
    tm_req = tm if tm is not None else tm_t
    tk_req = tk if tk is not None else tk_t

    # ---- K slab: 128-multiple divisor of H4 -> weights are never padded ----
    tk_eff = _pick_tk(H4, tk_req)

    # ---- token tile: as large as the VMEM budget allows (weight slabs are
    #      re-streamed once per token tile, so intensity on the weight path
    #      scales with tm) --------------------------------------------------
    tm_eff = min(_round_up(tm_req, 8), _round_up(N, 8))

    def ws(tm_, tk_):
        # x + out tiles (double-buffered), f32 accumulator, W_up/W_down slabs
        # (double-buffered), f32 GELU slab, small constants.
        return (4 * tm_ * H * isz + tm_ * H * 4
                + 4 * H * tk_ * isz + tm_ * tk_ * 4
                + 8 * (H + tk_) * isz)

    while ws(tm_eff, tk_eff) > budget:
        if tm_eff > 256:
            tm_eff = max(256, tm_eff // 2)
        elif tk_eff > 128 and H4 % 128 == 0:
            tk_eff = _pick_tk(H4, max(128, tk_eff // 2))
        elif tm_eff > 8:
            tm_eff = max(8, _round_up(tm_eff // 2, 8))
        else:
            break

    # Prefer an even (>=2) number of token tiles when there are several, so
    # the "parallel" axis 0 shards evenly across v7x's 2 TensorCores.
    n_tiles = _cdiv(N, tm_eff)
    if n_tiles >= 3 and n_tiles % 2 == 1:
        tm_eff = _round_up(_cdiv(N, n_tiles + 1), 8)

    n_pad = _round_up(N, tm_eff)
    nk = H4 // tk_eff

    # ---- only x gets (cheap) token-dim padding -----------------------------
    x2 = x.reshape(N, H)
    if n_pad != N:
        x2 = jnp.pad(x2, ((0, n_pad - N), (0, 0)))

    # 2-D views of 1-D params (TPU prefers >=2D refs).
    b_up2 = b_up.reshape(1, H4)
    b_down2 = b_down.reshape(1, H)
    gamma2 = gamma.reshape(1, H)
    beta2 = beta.reshape(1, H)

    grid = (n_pad // tm_eff, nk)

    # Zig-zag K order per token tile: the weight slab at the tile boundary is
    # identical across consecutive grid steps, so Pallas skips that DMA.
    def _kz(i, k):
        par = i % 2
        return k + par * (nk - 1 - 2 * k)

    const = dict(pipeline_mode=pl.Buffered(1))   # constant operands: 1 buffer

    out2 = pl.pallas_call(
        _ffn_kernel,
        out_shape=jax.ShapeDtypeStruct((n_pad, H), x.dtype),
        grid_spec=pltpu.PrefetchScalarGridSpec(
            num_scalar_prefetch=0,
            grid=grid,
            in_specs=[
                pl.BlockSpec((tm_eff, H), lambda i, k: (i, 0)),            # x tile
                pl.BlockSpec((H, tk_eff), lambda i, k: (0, _kz(i, k))),    # W_up slab
                pl.BlockSpec((1, tk_eff), lambda i, k: (0, _kz(i, k))),    # b_up slab
                pl.BlockSpec((tk_eff, H), lambda i, k: (_kz(i, k), 0)),    # W_down slab
                pl.BlockSpec((1, H), lambda i, k: (0, 0), **const),        # b_down
                pl.BlockSpec((1, H), lambda i, k: (0, 0), **const),        # gamma
                pl.BlockSpec((1, H), lambda i, k: (0, 0), **const),        # beta
            ],
            out_specs=pl.BlockSpec((tm_eff, H), lambda i, k: (i, 0)),
            scratch_shapes=[pltpu.VMEM((tm_eff, H), jnp.float32)],
        ),
        compiler_params=pltpu.CompilerParams(
            dimension_semantics=("parallel", "arbitrary"),
            vmem_limit_bytes=vmem_limit),
    )(x2, w_up, b_up2, w_down, b_down2, gamma2, beta2)

    # Keep this slice: padded token rows are finite but meaningless.
    return out2[:N].reshape(B, S, H)


def _reference(x, w_up, b_up, w_down, b_down, gamma, beta):
    """Pure-JAX reference mirroring the PyTorch forward (eval mode)."""
    h = jax.nn.gelu(x @ w_up + b_up, approximate=False)
    y = h @ w_down + b_down
    y = y + x
    mean = jnp.mean(y, axis=-1, keepdims=True)
    var = jnp.mean((y - mean) ** 2, axis=-1, keepdims=True)
    return (y - mean) / jnp.sqrt(var + 1e-5) * gamma + beta


def _make_params(key, H, dtype=jnp.float32):
    H4 = 4 * H
    kx, k1, k2, k3, k4, k5, k6 = jax.random.split(key, 7)
    w_up = (jax.random.normal(k1, (H, H4)) * 0.02).astype(dtype)
    b_up = (jax.random.normal(k2, (H4,)) * 0.02).astype(dtype)
    w_down = (jax.random.normal(k3, (H4, H)) * 0.02).astype(dtype)
    b_down = (jax.random.normal(k4, (H,)) * 0.02).astype(dtype)
    gamma = (1.0 + 0.1 * jax.random.normal(k5, (H,))).astype(dtype)
    beta = (0.05 * jax.random.normal(k6, (H,))).astype(dtype)
    return kx, (w_up, b_up, w_down, b_down, gamma, beta)


if __name__ == "__main__":
    key = jax.random.PRNGKey(0)

    # --- test 1: small config (batch=2, seq=8, hidden=32), single K slab ----
    B, S, H = 2, 8, 32
    kx, params = _make_params(key, H, jnp.float32)
    x = jax.random.normal(kx, (B, S, H), dtype=jnp.float32)

    out = feed_forward(x, *params)
    out = jax.block_until_ready(out)
    ref = _reference(x, *params)
    assert out.shape == (B, S, H)
    assert jnp.allclose(out, ref, atol=1e-4, rtol=1e-4), (
        float(jnp.max(jnp.abs(out - ref))))

    # --- test 2: exercises K-tiling (H4=256, tk=128 -> 2 K steps, no weight
    #     padding since 128 | 256) and token padding (N=10 -> 16) ------------
    B2, S2, H2 = 2, 5, 64
    kx2, params2 = _make_params(jax.random.PRNGKey(1), H2, jnp.float32)
    x2 = jax.random.normal(kx2, (B2, S2, H2), dtype=jnp.float32)

    out2 = feed_forward(x2, *params2, tk=128)
    out2 = jax.block_until_ready(out2)
    ref2 = _reference(x2, *params2)
    assert out2.shape == (B2, S2, H2)
    assert jnp.allclose(out2, ref2, atol=1e-4, rtol=1e-4), (
        float(jnp.max(jnp.abs(out2 - ref2))))

    # --- test 3: bf16 weights/activations fed natively to the MXU, checked
    #     against an f32 reference of the same bf16-rounded operands ---------
    x_bf = x.astype(jnp.bfloat16)
    params_bf = tuple(p.astype(jnp.bfloat16) for p in params)
    out_bf = jax.block_until_ready(feed_forward(x_bf, *params_bf))
    assert out_bf.shape == (B, S, H) and out_bf.dtype == jnp.bfloat16
    ref_bf = _reference(x_bf.astype(jnp.float32),
                        *(p.astype(jnp.float32) for p in params_bf))
    assert bool(jnp.all(jnp.isfinite(out_bf.astype(jnp.float32))))
    assert jnp.allclose(out_bf.astype(jnp.float32), ref_bf,
                        atol=6e-2, rtol=6e-2), (
        float(jnp.max(jnp.abs(out_bf.astype(jnp.float32) - ref_bf))))

    print("KERNEL_OK")
</pallas_src>

<mosaic_0001>
module attributes {stable_mosaic.version = 11 : i64} {
  func.func @_ffn_kernel(%arg0: i32, %arg1: i32, %arg2: memref<16x32xf32, #tpu.memory_space<vmem>>, %arg3: memref<32x128xf32, #tpu.memory_space<vmem>>, %arg4: memref<1x128xf32, #tpu.memory_space<vmem>>, %arg5: memref<128x32xf32, #tpu.memory_space<vmem>>, %arg6: memref<1x32xf32, #tpu.memory_space<vmem>>, %arg7: memref<1x32xf32, #tpu.memory_space<vmem>>, %arg8: memref<1x32xf32, #tpu.memory_space<vmem>>, %arg9: memref<16x32xf32, #tpu.memory_space<vmem>>, %arg10: memref<16x32xf32, #tpu.memory_space<vmem>>) attributes {dimension_semantics = [#tpu.dimension_semantics<parallel>, #tpu.dimension_semantics<arbitrary>], iteration_bounds = array<i64: 1, 1>, scalar_prefetch = 0 : i64, scratch_operands = 1 : i64, tpu.core_type = #tpu.core_type<tc>, window_params = [{transform_indices = @transform_0, window_bounds = array<i64: 16, 32>}, {transform_indices = @transform_1, window_bounds = array<i64: 32, 128>}, {transform_indices = @transform_2, window_bounds = array<i64: 1, 128>}, {transform_indices = @transform_3, window_bounds = array<i64: 128, 32>}, {pipeline_mode = #tpu.pipeline_mode<synchronous>, transform_indices = @transform_4, window_bounds = array<i64: 1, 32>}, {pipeline_mode = #tpu.pipeline_mode<synchronous>, transform_indices = @transform_5, window_bounds = array<i64: 1, 32>}, {pipeline_mode = #tpu.pipeline_mode<synchronous>, transform_indices = @transform_6, window_bounds = array<i64: 1, 32>}, {transform_indices = @transform_7, window_bounds = array<i64: 16, 32>}]} {
    %c0 = arith.constant 0 : index
    %c0_0 = arith.constant 0 : index
    %0 = vector.load %arg2[%c0, %c0_0] : memref<16x32xf32, #tpu.memory_space<vmem>>, vector<16x32xf32>
    %c0_1 = arith.constant 0 : index
    %c0_2 = arith.constant 0 : index
    %1 = vector.load %arg3[%c0_1, %c0_2] : memref<32x128xf32, #tpu.memory_space<vmem>>, vector<32x128xf32>
    %cst = arith.constant dense<0.000000e+00> : vector<16x128xf32>
    %2 = tpu.matmul %0, %1, %cst {dimension_numbers = #tpu.dot_dimension_numbers<[1], [0], [0], [1], [0, 0, 1, 1], [], []>} : vector<16x32xf32>, vector<32x128xf32>, vector<16x128xf32> -> vector<16x128xf32>
    %c0_3 = arith.constant 0 : index
    %c0_4 = arith.constant 0 : index
    %3 = vector.load %arg4[%c0_3, %c0_4] : memref<1x128xf32, #tpu.memory_space<vmem>>, vector<1x128xf32>
    %4 = vector.broadcast %3 : vector<1x128xf32> to vector<16x128xf32>
    %5 = arith.addf %2, %4 : vector<16x128xf32>
    %cst_5 = arith.constant 5.000000e-01 : f32
    %6 = vector.broadcast %cst_5 : f32 to vector<16x128xf32>
    %7 = arith.mulf %6, %5 : vector<16x128xf32>
    %cst_6 = arith.constant 0.707106769 : f32
    %8 = vector.broadcast %cst_6 : f32 to vector<16x128xf32>
    %9 = arith.mulf %5, %8 : vector<16x128xf32>
    %10 = math.erf %9 : vector<16x128xf32>
    %cst_7 = arith.constant 1.000000e+00 : f32
    %11 = vector.broadcast %cst_7 : f32 to vector<16x128xf32>
    %12 = arith.addf %11, %10 : vector<16x128xf32>
    %13 = arith.mulf %7, %12 : vector<16x128xf32>
    %c0_8 = arith.constant 0 : index
    %c0_9 = arith.constant 0 : index
    %14 = vector.load %arg5[%c0_8, %c0_9] : memref<128x32xf32, #tpu.memory_space<vmem>>, vector<128x32xf32>
    %cst_10 = arith.constant dense<0.000000e+00> : vector<16x32xf32>
    %15 = tpu.matmul %13, %14, %cst_10 {dimension_numbers = #tpu.dot_dimension_numbers<[1], [0], [0], [1], [0, 0, 1, 1], [], []>} : vector<16x128xf32>, vector<128x32xf32>, vector<16x32xf32> -> vector<16x32xf32>
    %c0_i32 = arith.constant 0 : i32
    %16 = arith.cmpi eq, %arg1, %c0_i32 : i32
    %17 = arith.extui %16 : i1 to i32
    %c0_i32_11 = arith.constant 0 : i32
    %18 = arith.cmpi ne, %17, %c0_i32_11 : i32
    scf.if %18 {
      %c0_16 = arith.constant 0 : index
      %c0_17 = arith.constant 0 : index
      %25 = vector.load %arg10[%c0_16, %c0_17] : memref<16x32xf32, #tpu.memory_space<vmem>>, vector<16x32xf32>
      tpu.vector_store %arg10[%c0_16, %c0_17], %15 {strides = array<i32>} : memref<16x32xf32, #tpu.memory_space<vmem>>, vector<16x32xf32>,
    } else {
    }
    %c0_i32_12 = arith.constant 0 : i32
    %19 = arith.cmpi ne, %arg1, %c0_i32_12 : i32
    %20 = arith.extui %19 : i1 to i32
    %c0_i32_13 = arith.constant 0 : i32
    %21 = arith.cmpi ne, %20, %c0_i32_13 : i32
    scf.if %21 {
      %c0_16 = arith.constant 0 : index
      %c0_17 = arith.constant 0 : index
      %25 = vector.load %arg10[%c0_16, %c0_17] : memref<16x32xf32, #tpu.memory_space<vmem>>, vector<16x32xf32>
      %26 = arith.addf %25, %15 : vector<16x32xf32>
      %c0_18 = arith.constant 0 : index
      %c0_19 = arith.constant 0 : index
      %27 = vector.load %arg10[%c0_18, %c0_19] : memref<16x32xf32, #tpu.memory_space<vmem>>, vector<16x32xf32>
      tpu.vector_store %arg10[%c0_18, %c0_19], %26 {strides = array<i32>} : memref<16x32xf32, #tpu.memory_space<vmem>>, vector<16x32xf32>,
    } else {
    }
    %c0_i32_14 = arith.constant 0 : i32
    %22 = arith.cmpi eq, %arg1, %c0_i32_14 : i32
    %23 = arith.extui %22 : i1 to i32
    %c0_i32_15 = arith.constant 0 : i32
    %24 = arith.cmpi ne, %23, %c0_i32_15 : i32
    scf.if %24 {
      %c0_16 = arith.constant 0 : index
      %c0_17 = arith.constant 0 : index
      %25 = vector.load %arg10[%c0_16, %c0_17] : memref<16x32xf32, #tpu.memory_space<vmem>>, vector<16x32xf32>
      %c0_18 = arith.constant 0 : index
      %c0_19 = arith.constant 0 : index
      %26 = vector.load %arg6[%c0_18, %c0_19] : memref<1x32xf32, #tpu.memory_space<vmem>>, vector<1x32xf32>
      %27 = vector.broadcast %26 : vector<1x32xf32> to vector<16x32xf32>
      %28 = arith.addf %25, %27 : vector<16x32xf32>
      %29 = arith.addf %28, %0 : vector<16x32xf32>
      %cst_20 = arith.constant dense<0.000000e+00> : vector<16xf32>
      %30 = vector.multi_reduction <add>, %29, %cst_20 [1] : vector<16x32xf32> to vector<16xf32>
      %31 = vector.shape_cast %30 : vector<16xf32> to vector<16x1xf32>
      %cst_21 = arith.constant 3.200000e+01 : f32
      %32 = vector.broadcast %cst_21 : f32 to vector<16x1xf32>
      %33 = arith.divf %31, %32 : vector<16x1xf32>
      %34 = arith.mulf %29, %29 : vector<16x32xf32>
      %cst_22 = arith.constant dense<0.000000e+00> : vector<16xf32>
      %35 = vector.multi_reduction <add>, %34, %cst_22 [1] : vector<16x32xf32> to vector<16xf32>
      %36 = vector.shape_cast %35 : vector<16xf32> to vector<16x1xf32>
      %cst_23 = arith.constant 3.200000e+01 : f32
      %37 = vector.broadcast %cst_23 : f32 to vector<16x1xf32>
      %38 = arith.divf %36, %37 : vector<16x1xf32>
      %39 = arith.mulf %33, %33 : vector<16x1xf32>
      %40 = arith.subf %38, %39 : vector<16x1xf32>
      %41 = vector.broadcast %33 : vector<16x1xf32> to vector<16x32xf32>
      %42 = arith.subf %29, %41 : vector<16x32xf32>
      %cst_24 = arith.constant 9.99999974E-6 : f32
      %43 = vector.broadcast %cst_24 : f32 to vector<16x1xf32>
      %44 = arith.addf %40, %43 : vector<16x1xf32>
      %45 = math.rsqrt %44 : vector<16x1xf32>
      %46 = vector.broadcast %45 : vector<16x1xf32> to vector<16x32xf32>
      %47 = arith.mulf %42, %46 : vector<16x32xf32>
      %c0_25 = arith.constant 0 : index
      %c0_26 = arith.constant 0 : index
      %48 = vector.load %arg7[%c0_25, %c0_26] : memref<1x32xf32, #tpu.memory_space<vmem>>, vector<1x32xf32>
      %49 = vector.broadcast %48 : vector<1x32xf32> to vector<16x32xf32>
      %50 = arith.mulf %47, %49 : vector<16x32xf32>
      %c0_27 = arith.constant 0 : index
      %c0_28 = arith.constant 0 : index
      %51 = vector.load %arg8[%c0_27, %c0_28] : memref<1x32xf32, #tpu.memory_space<vmem>>, vector<1x32xf32>
      %52 = vector.broadcast %51 : vector<1x32xf32> to vector<16x32xf32>
      %53 = arith.addf %50, %52 : vector<16x32xf32>
      %c0_29 = arith.constant 0 : index
      %c0_30 = arith.constant 0 : index
      %54 = vector.load %arg9[%c0_29, %c0_30] : memref<16x32xf32, #tpu.memory_space<vmem>>, vector<16x32xf32>
      tpu.vector_store %arg9[%c0_29, %c0_30], %53 {strides = array<i32>} : memref<16x32xf32, #tpu.memory_space<vmem>>, vector<16x32xf32>,
    } else {
    }
    return
  }
  func.func @transform_0(%arg0: i32, %arg1: i32) -> (i32, i32) {
    %c0_i32 = arith.constant 0 : i32
    %c0_i32_0 = arith.constant 0 : i32
    return %arg0, %c0_i32 : i32, i32
  }
  func.func @transform_1(%arg0: i32, %arg1: i32) -> (i32, i32) {
    %c2_i32 = arith.constant 2 : i32
    %c0_i32 = arith.constant 0 : i32
    %0 = arith.cmpi eq, %c2_i32, %c0_i32 : i32
    %c1_i32 = arith.constant 1 : i32
    %1 = arith.select %0, %c1_i32, %c2_i32 : i32
    %2 = arith.remsi %arg0, %1 : i32
    %c0_i32_0 = arith.constant 0 : i32
    %3 = arith.cmpi ne, %2, %c0_i32_0 : i32
    %c0_i32_1 = arith.constant 0 : i32
    %4 = arith.cmpi slt, %2, %c0_i32_1 : i32
    %c0_i32_2 = arith.constant 0 : i32
    %5 = arith.cmpi slt, %1, %c0_i32_2 : i32
    %6 = arith.xori %4, %5 : i1
    %7 = arith.andi %6, %3 : i1
    %8 = arith.addi %2, %1 : i32
    %9 = arith.select %7, %8, %2 : i32
    %c2_i32_3 = arith.constant 2 : i32
    %10 = arith.muli %c2_i32_3, %arg1 : i32
    %c0_i32_4 = arith.constant 0 : i32
    %11 = arith.subi %c0_i32_4, %10 : i32
    %12 = arith.muli %9, %11 : i32
    %13 = arith.addi %arg1, %12 : i32
    %c0_i32_5 = arith.constant 0 : i32
    %c0_i32_6 = arith.constant 0 : i32
    return %c0_i32_5, %13 : i32, i32
  }
  func.func @transform_2(%arg0: i32, %arg1: i32) -> (i32, i32) {
    %c2_i32 = arith.constant 2 : i32
    %c0_i32 = arith.constant 0 : i32
    %0 = arith.cmpi eq, %c2_i32, %c0_i32 : i32
    %c1_i32 = arith.constant 1 : i32
    %1 = arith.select %0, %c1_i32, %c2_i32 : i32
    %2 = arith.remsi %arg0, %1 : i32
    %c0_i32_0 = arith.constant 0 : i32
    %3 = arith.cmpi ne, %2, %c0_i32_0 : i32
    %c0_i32_1 = arith.constant 0 : i32
    %4 = arith.cmpi slt, %2, %c0_i32_1 : i32
    %c0_i32_2 = arith.constant 0 : i32
    %5 = arith.cmpi slt, %1, %c0_i32_2 : i32
    %6 = arith.xori %4, %5 : i1
    %7 = arith.andi %6, %3 : i1
    %8 = arith.addi %2, %1 : i32
    %9 = arith.select %7, %8, %2 : i32
    %c2_i32_3 = arith.constant 2 : i32
    %10 = arith.muli %c2_i32_3, %arg1 : i32
    %c0_i32_4 = arith.constant 0 : i32
    %11 = arith.subi %c0_i32_4, %10 : i32
    %12 = arith.muli %9, %11 : i32
    %13 = arith.addi %arg1, %12 : i32
    %c0_i32_5 = arith.constant 0 : i32
    %c0_i32_6 = arith.constant 0 : i32
    return %c0_i32_5, %13 : i32, i32
  }
  func.func @transform_3(%arg0: i32, %arg1: i32) -> (i32, i32) {
    %c2_i32 = arith.constant 2 : i32
    %c0_i32 = arith.constant 0 : i32
    %0 = arith.cmpi eq, %c2_i32, %c0_i32 : i32
    %c1_i32 = arith.constant 1 : i32
    %1 = arith.select %0, %c1_i32, %c2_i32 : i32
    %2 = arith.remsi %arg0, %1 : i32
    %c0_i32_0 = arith.constant 0 : i32
    %3 = arith.cmpi ne, %2, %c0_i32_0 : i32
    %c0_i32_1 = arith.constant 0 : i32
    %4 = arith.cmpi slt, %2, %c0_i32_1 : i32
    %c0_i32_2 = arith.constant 0 : i32
    %5 = arith.cmpi slt, %1, %c0_i32_2 : i32
    %6 = arith.xori %4, %5 : i1
    %7 = arith.andi %6, %3 : i1
    %8 = arith.addi %2, %1 : i32
    %9 = arith.select %7, %8, %2 : i32
    %c2_i32_3 = arith.constant 2 : i32
    %10 = arith.muli %c2_i32_3, %arg1 : i32
    %c0_i32_4 = arith.constant 0 : i32
    %11 = arith.subi %c0_i32_4, %10 : i32
    %12 = arith.muli %9, %11 : i32
    %13 = arith.addi %arg1, %12 : i32
    %c0_i32_5 = arith.constant 0 : i32
    %c0_i32_6 = arith.constant 0 : i32
    return %13, %c0_i32_5 : i32, i32
  }
  func.func @transform_4(%arg0: i32, %arg1: i32) -> (i32, i32) {
    %c0_i32 = arith.constant 0 : i32
    %c0_i32_0 = arith.constant 0 : i32
    %c0_i32_1 = arith.constant 0 : i32
    return %c0_i32, %c0_i32_0 : i32, i32
  }
  func.func @transform_5(%arg0: i32, %arg1: i32) -> (i32, i32) {
    %c0_i32 = arith.constant 0 : i32
    %c0_i32_0 = arith.constant 0 : i32
    %c0_i32_1 = arith.constant 0 : i32
    return %c0_i32, %c0_i32_0 : i32, i32
  }
  func.func @transform_6(%arg0: i32, %arg1: i32) -> (i32, i32) {
    %c0_i32 = arith.constant 0 : i32
    %c0_i32_0 = arith.constant 0 : i32
    %c0_i32_1 = arith.constant 0 : i32
    return %c0_i32, %c0_i32_0 : i32, i32
  }
  func.func @transform_7(%arg0: i32, %arg1: i32) -> (i32, i32) {
    %c0_i32 = arith.constant 0 : i32
    %c0_i32_0 = arith.constant 0 : i32
    return %arg0, %c0_i32 : i32, i32
  }
}

</mosaic_0001>

<bundles_post_ra>
// kernel: feed_forward.1
= control target key start
LH: loop header
LB: loop body
LE: loop exit
PB: predicated region body
PF: predicated region fallthrough
CT: control target
= control target key end

     0   :  { %s780_s0 = inlined_call_operand.vmem [shape: f32[16,32], index: 0, kind: input, shape index: {}]   ;;  %s781_s1 = inlined_call_operand.vmem [shape: f32[32,128], index: 1, kind: input, shape index: {}]   ;;  %s782_s2 = inlined_call_operand.vmem [shape: f32[1,128], index: 2, kind: input, shape index: {}]   ;;  %s783_s3 = inlined_call_operand.vmem [shape: f32[128,32], index: 3, kind: input, shape index: {}]   ;;  %s784_s4 = inlined_call_operand.vmem [shape: f32[1,32], index: 4, kind: input, shape index: {}]   ;;  %s785_s5 = inlined_call_operand.vmem [shape: f32[1,32], index: 5, kind: input, shape index: {}]   ;;  %s786_s6 = inlined_call_operand.vmem [shape: f32[1,32], index: 6, kind: input, shape index: {}]   ;;  %s787_s7 = inlined_call_operand.hbm [shape: f32[16,32], index: 7, kind: output, shape index: {}]  }
   0x1   :  { %v250_v0 = vld [vmem:[%s781_s1 + $0x18] sm:$0xff]  ;;  %v249_v1 = vld [vmem:[%s781_s1 + $0x10] sm:$0xff]  ;;  %v248_v2 = vld [vmem:[%s781_s1 + $0x8] sm:$0xff] }
   0x2   :  { %274 = vmatpush.msra.mxu0 %v250_v0 }
   0x4   :  { %275 = vmatpush.msra.mxu0 %v249_v1 }
   0x5   :  { %12 = vsyncpa [#allocation4], 0  ;;  %v247_v3 = vld [vmem:[%s781_s1] sm:$0xff]  ;;  %vm255_vm0 = vcmask 261120   ;;  %v673_v5 = vld [vmem:[%s780_s0 + $0x8] sm:$0xff]  ;;  %s516_s25 = sshll.u32 %s787_s7, 4  ;;  %s517_s25 = int_to_ptr.hbm [resolvable:$true] %s516_s25 }
   0x6   :  { %276 = vmatpush.msra.mxu0 %v248_v2  ;;  %v666_v4 = vld [vmem:[%s780_s0] sm:$0xff]  ;;  %v388_v6 = vld [vmem:[%s783_s3 + $0x78] sm:$0xff]  ;;  %v387_v7 = vld [vmem:[%s783_s3 + $0x70] sm:$0xff]  ;;  %s609_s26 = smov 128  }
   0x7   :  { %389 = vmatpush.msra.mxu1 %v388_v6  ;;  %547 = vmatpush.msra.mxu2 %v388_v6  ;;  %v386_v8 = vld [vmem:[%s783_s3 + $0x68] sm:$0xff]  ;;  %v385_v9 = vld [vmem:[%s783_s3 + $0x60] sm:$0xff]  ;;  %v384_v11 = vld [vmem:[%s783_s3 + $0x58] sm:$0xff] }
   0x8   :  { %277 = vmatpush.msra.mxu0 %v247_v3  ;;  %v567_v10 = vld [vmem:[%s782_s2] ss:$0 sm:$0xff]  ;;  %v383_v13 = vld [vmem:[%s783_s3 + $0x50] sm:$0xff]  ;;  %v382_v15 = vld [vmem:[%s783_s3 + $0x48] sm:$0xff]  ;;  %s610_s2 = smov 8  }
   0x9   :  { %543 = vmatmul.msk.f32.vlgmr.msra.gmra.mxu0 %vm255_vm0, %v666_v4  ;;  %390 = vmatpush.msra.mxu1 %v387_v7  ;;  %v381_v17 = vld [vmem:[%s783_s3 + $0x40] sm:$0xff]  ;;  %v380_v19 = vld [vmem:[%s783_s3 + $0x38] sm:$0xff]  ;;  %v379_v20 = vld [vmem:[%s783_s3 + $0x30] sm:$0xff] }
   0xa   :  { %548 = vmatpush.msra.mxu2 %v387_v7  ;;  %v378_v23 = vld [vmem:[%s783_s3 + $0x28] sm:$0xff]  ;;  %v377_v27 = vld [vmem:[%s783_s3 + $0x20] sm:$0xff]  ;;  %v376_v30 = vld [vmem:[%s783_s3 + $0x18] sm:$0xff] }
   0xb   :  { %391 = vmatpush.msra.mxu1 %v386_v8  ;;  %v375_v34 = vld [vmem:[%s783_s3 + $0x10] sm:$0xff]  ;;  %v374_v37 = vld [vmem:[%s783_s3 + $0x8] sm:$0xff]  ;;  %v373_v42 = vld [vmem:[%s783_s3] sm:$0xff] }
   0xc   :  { %549 = vmatpush.msra.mxu2 %v386_v8 }
   0xd   :  { %392 = vmatpush.msra.mxu1 %v385_v9 }
   0xe   :  { %550 = vmatpush.msra.mxu2 %v385_v9 }
   0xf   :  { %393 = vmatpush.msra.mxu1 %v384_v11 }
  0x10   :  { %551 = vmatpush.msra.mxu2 %v384_v11 }
  0x11   :  { %544 = vmatmul.msk.f32.gmra.mxu0 %vm255_vm0, %v673_v5  ;;  %394 = vmatpush.msra.mxu1 %v383_v13 }
  0x12   :  { %552 = vmatpush.msra.mxu2 %v383_v13 }
  0x13   :  { %395 = vmatpush.msra.mxu1 %v382_v15 }
  0x14   :  { %553 = vmatpush.msra.mxu2 %v382_v15 }
  0x15   :  { %396 = vmatpush.msra.mxu1 %v381_v17 }
  0x16   :  { %554 = vmatpush.msra.mxu2 %v381_v17 }
  0x17   :  { %397 = vmatpush.msra.mxu1 %v380_v19 }
  0x18   :  { %555 = vmatpush.msra.mxu2 %v380_v19 }
  0x19   :  { %398 = vmatpush.msra.mxu1 %v379_v20 }
  0x1a   :  { %556 = vmatpush.msra.mxu2 %v379_v20 }
  0x1b   :  { %399 = vmatpush.msra.mxu1 %v378_v23 }
  0x1c   :  { %557 = vmatpush.msra.mxu2 %v378_v23 }
  0x1d   :  { %400 = vmatpush.msra.mxu1 %v377_v27 }
  0x1e   :  { %558 = vmatpush.msra.mxu2 %v377_v27 }
  0x1f   :  { %401 = vmatpush.msra.mxu1 %v376_v30 }
  0x20   :  { %559 = vmatpush.msra.mxu2 %v376_v30 }
  0x21   :  { %402 = vmatpush.msra.mxu1 %v375_v34 }
  0x22   :  { %560 = vmatpush.msra.mxu2 %v375_v34 }
  0x23   :  { %403 = vmatpush.msra.mxu1 %v374_v37 }
  0x24   :  { %561 = vmatpush.msra.mxu2 %v374_v37 }
  0x25   :  { %404 = vmatpush.msra.mxu1 %v373_v42 }
  0x26   :  { %562 = vmatpush.msra.mxu2 %v373_v42 }
  0x86   :  { %v279_v12 = vpop.f32.mrf.mxu0 }
  0x87   :  { %v698_v14 = vadd.f32 %v567_v10, %v279_v12 }
  0x89   :  { %v704_v16 = vmul.f32 0.70710677, %v698_v14 }
  0x8b   :  { %v289_v18 = vmul.f32 %v704_v16, %v704_v16 }
  0x8d   :  { %v717_v21 = vmin.f32 %v289_v18, 16.0 }
  0x8e   :  { %v282_v22 = vpop.f32.mrf.mxu0 }
  0x8f   :  { %v291_v24 = vmul.f32 2.1237322e-06, %v717_v21  ;;  %v723_v25 = vadd.f32 %v567_v10, %v282_v22  ;;  %v302_v26 = vmul.f32 3.8918573e-05, %v717_v21 }
  0x91   :  { %v292_v28 = vadd.f32 0.00028619796, %v291_v24  ;;  %v730_v29 = vmul.f32 0.70710677, %v723_v25  ;;  %v303_v31 = vadd.f32 0.001143296, %v302_v26 }
  0x93   :  { %v293_v32 = vmul.f32 %v292_v28, %v717_v21  ;;  %v329_v33 = vmul.f32 %v730_v29, %v730_v29  ;;  %v304_v35 = vmul.f32 %v303_v31, %v717_v21 }
  0x95   :  { %v330_v36 = vmin.f32 %v329_v33, 16.0  ;;  %v305_v38 = vadd.f32 0.014752088, %v304_v35  ;;  %v294_v39 = vadd.f32 0.0036580483, %v293_v32  ;;  %v285_v35 = vmul.f32 0.5, %v698_v14 }
  0x96   :  { %v568_v14 = vld [vmem:[%s784_s4] ss:$0 sm:$0xff] }
  0x97   :  { %v331_v40 = vmul.f32 2.1237322e-06, %v330_v36  ;;  %v342_v41 = vmul.f32 3.8918573e-05, %v330_v36  ;;  %v306_v43 = vmul.f32 %v305_v38, %v717_v21  ;;  %v295_v47 = vmul.f32 %v294_v39, %v717_v21 }
  0x99   :  { %v332_v44 = vadd.f32 0.00028619796, %v331_v40  ;;  %v343_v45 = vadd.f32 0.001143296, %v342_v41  ;;  %v307_v46 = vadd.f32 0.112945676, %v306_v43 }
  0x9a   :  { %v296_v54 = vadd.f32 0.05243302, %v295_v47  ;;  %v286_v43 = vmul.f32 0.5, %v723_v25 }
  0x9b   :  { %v333_v48 = vmul.f32 %v332_v44, %v330_v36  ;;  %v344_v49 = vmul.f32 %v343_v45, %v330_v36  ;;  %v308_v50 = vmul.f32 %v307_v46, %v717_v21 }
  0x9c   :  { %v297_v60 = vmul.f32 %v296_v54, %v717_v21 }
  0x9d   :  { %v345_v51 = vadd.f32 0.014752088, %v344_v49  ;;  %v334_v52 = vadd.f32 0.0036580483, %v333_v48  ;;  %v309_v53 = vadd.f32 0.4994258, %v308_v50 }
  0x9e   :  { %v298_v0 = vadd.f32 0.18741608, %v297_v60 }
  0x9f   :  { %v346_v55 = vmul.f32 %v345_v51, %v330_v36  ;;  %v310_v56 = vmul.f32 %v309_v53, %v717_v21  ;;  %v335_v58 = vmul.f32 %v334_v52, %v330_v36 }
  0xa0   :  { %v299_v7 = vmul.f32 %v298_v0, %v717_v21 }
  0xa1   :  { %v347_v57 = vadd.f32 0.112945676, %v346_v55  ;;  %v311_v59 = vadd.f32 1.0, %v310_v56  ;;  %v336_v63 = vadd.f32 0.05243302, %v335_v58 }
  0xa2   :  { %v300_v12 = vadd.f32 1.1283791, %v299_v7 }
  0xa3   :  { %v348_v61 = vmul.f32 %v347_v57, %v330_v36  ;;  %571 = vrcp.f32 %v311_v59  ;;  %v337_v6 = vmul.f32 %v336_v63, %v330_v36  ;;  %v323_v11 = vand.u32 2147483648, %v311_v59 }
  0xa4   :  { %v321_v15 = vand.u32 2147483647, %v311_v59  ;;  %vm317_vm2 = vweird.f32 %v311_v59  ;;  %v301_v23 = vmul.f32 %v300_v12, %v704_v16  ;;  %v607_v57 = vmov 32.0  }
  0xa5   :  { %v349_v62 = vadd.f32 0.4994258, %v348_v61  ;;  %v338_v10 = vadd.f32 0.18741608, %v337_v6  ;;  %v324_v20 = vor.u32 1.1754944e-38, %v323_v11 }
  0xa6   :  { %vm322_vm4 = vcmp.eq.f32.partialorder %v321_v15, 8.507059e+37 }
  0xa7   :  { %v350_v1 = vmul.f32 %v349_v62, %v330_v36  ;;  %v339_v19 = vmul.f32 %v338_v10, %v330_v36 }
  0xa9   :  { %v351_v2 = vadd.f32 1.0, %v350_v1  ;;  %v572_v3 = vpop.eup %571  ;;  %v340_v30 = vadd.f32 1.1283791, %v339_v19 }
  0xaa   :  { %v313_v8 = vmul.f32 %v572_v3, %v311_v59  ;;  %vm318_vm1 = vweird.f32 %v572_v3 }
  0xab   :  { %573 = vrcp.f32 %v351_v2  ;;  %vm319_vm3 = vmor %vm317_vm2, %vm318_vm1  ;;  %v363_v28 = vand.u32 2147483648, %v351_v2  ;;  %v361_v32 = vand.u32 2147483647, %v351_v2  ;;  %vm357_vm6 = vweird.f32 %v351_v2 }
  0xac   :  { %v314_v9 = vsub.f32 1.0, %v313_v8  ;;  %v341_v16 = vmul.f32 %v340_v30, %v730_v29  ;;  %575 = vrcp.f32 %v607_v57 }
  0xad   :  { %v364_v37 = vor.u32 1.1754944e-38, %v363_v28  ;;  %vm362_vm8 = vcmp.eq.f32.partialorder %v361_v32, 8.507059e+37  ;;  %v570_v28 = vld [vmem:[%s786_s6] ss:$0 sm:$0xff] }
  0xae   :  { %v315_v13 = vmul.f32 %v572_v3, %v314_v9 }
  0xb0   :  { %v316_v18 = vadd.f32 %v572_v3, %v315_v13 }
  0xb1   :  { %v574_v17 = vpop.eup %573 }
  0xb2   :  { %v353_v22 = vmul.f32 %v574_v17, %v351_v2  ;;  %v320_v24 = vsel %vm319_vm3, %v572_v3, %v316_v18  ;;  %vm358_vm5 = vweird.f32 %v574_v17  ;;  %v576_v58 = vpop.eup %575 }
  0xb3   :  { %v325_v21 = vsel %vm322_vm4, %v324_v20, %v320_v24  ;;  %vm359_vm7 = vmor %vm357_vm6, %vm358_vm5  ;;  %v448_v59 = vmul.f32 32.0, %v576_v58  ;;  %vm452_vm9 = vweird.f32 %v576_v58 }
  0xb4   :  { %v354_v26 = vsub.f32 1.0, %v353_v22  ;;  %v326_v27 = vmul.f32 %v325_v21, %v301_v23  ;;  %v569_v21 = vld [vmem:[%s785_s5] ss:$0 sm:$0xff]  ;;  %s608_s5 = smov [#allocation3]  }
  0xb5   :  { %v449_v60 = vsub.f32 1.0, %v448_v59  ;;  %s514_s23 = sshll.u32 %s608_s5, 4  ;;  %s515_s23 = int_to_ptr.vmem [resolvable:$true] %s514_s23 }
  0xb6   :  { %v355_v31 = vmul.f32 %v574_v17, %v354_v26  ;;  %v545_v33 = vclamps-f32 %v326_v27, 1.0 }
  0xb7   :  { %v450_v61 = vmul.f32 %v576_v58, %v449_v60 }
  0xb8   :  { %v356_v34 = vadd.f32 %v574_v17, %v355_v31  ;;  %v369_v36 = vadd.f32 1.0, %v545_v33 }
  0xb9   :  { %v451_v62 = vadd.f32 %v576_v58, %v450_v61 }
  0xba   :  { %v360_v38 = vsel %vm359_vm7, %v574_v17, %v356_v34  ;;  %v371_v39 = vmul.f32 %v369_v36, %v285_v35 }
  0xbb   :  { %v365_v40 = vsel %vm362_vm8, %v364_v37, %v360_v38  ;;  %v453_v63 = vsel %vm452_vm9, %v576_v58, %v451_v62 }
  0xbc   :  { %v366_v41 = vmul.f32 %v365_v40, %v341_v16  ;;  %405 = vmatmul.f32.vlgmr.msra.gmra.mxu1 %v371_v39 }
  0xbe   :  { %v546_v42 = vclamps-f32 %v366_v41, 1.0 }
  0xc0   :  { %v370_v44 = vadd.f32 1.0, %v546_v42 }
  0xc2   :  { %v372_v45 = vmul.f32 %v370_v44, %v286_v43 }
  0xc4   :  { %408 = vmatmul.f32.vlgmr.msra.gmra.mxu2 %v372_v45 }
 0x139   :  { %v406_v46 = vpop.f32.mrf.mxu1 }
 0x13a   :  { %416 = vst.msk [vmem:[#allocation2] sm:$0xff] %vm255_vm0, %v406_v46 }
 0x141   :  { %v431_v29 = vld [vmem:[#allocation2] sm:$0xff] }
 0x142   :  { %v437_v47 = vadd.f32 %v568_v14, %v431_v29 }
 0x144   :  { %v439_v48 = vadd.f32 %v437_v47, %v666_v4 }
 0x146   :  { %v441_v50 = vsel %vm255_vm0, %v439_v48, 0.0  ;;  %v456_v51 = vmul.f32 %v439_v48, %v439_v48 }
 0x147   :  { %v409_v49 = vpop.f32.mrf.mxu2  ;;  %442 = vadd.xlane.f32.xlu0 %v441_v50 }
 0x148   :  { %417 = vst.msk [vmem:[#allocation2 + $0x8] sm:$0xff] %vm255_vm0, %v409_v49  ;;  %v458_v25 = vsel %vm255_vm0, %v456_v51, 0.0 }
 0x149   :  { %459 = vadd.xlane.f32.xlu1 %v458_v25 }
 0x14f   :  { %v432_v52 = vld [vmem:[#allocation2 + $0x8] sm:$0xff] }
 0x150   :  { %v438_v53 = vadd.f32 %v568_v14, %v432_v52 }
 0x152   :  { %v440_v54 = vadd.f32 %v438_v53, %v673_v5 }
 0x154   :  { %v444_v55 = vsel %vm255_vm0, %v440_v54, 0.0  ;;  %v457_v56 = vmul.f32 %v440_v54, %v440_v54 }
 0x155   :  { %445 = vadd.xlane.f32.xlu0 %v444_v55 }
 0x156   :  { %v461_v4 = vsel %vm255_vm0, %v457_v56, 0.0 }
 0x157   :  { %462 = vadd.xlane.f32.xlu1 %v461_v4 }
 0x1ba   :  { %v443_v0 = vpop.xlane.xlu0 %442 }
 0x1bb   :  { %v454_v1 = vmul.f32 %v453_v63, %v443_v0 }
 0x1bc   :  { %v460_v2 = vpop.xlane.xlu1 %459 }
 0x1bd   :  { %v466_v5 = vmul.f32 %v454_v1, %v454_v1  ;;  %v464_v3 = vmul.f32 %v460_v2, %v453_v63  ;;  %v470_v24 = vsub.f32 %v439_v48, %v454_v1 }
 0x1bf   :  { %v468_v6 = vsub.f32 %v464_v3, %v466_v5 }
 0x1c1   :  { %v472_v7 = vadd.f32 1e-05, %v468_v6 }
 0x1c3   :  { %577 = vrsqrt.f32 %v472_v7  ;;  %vm480_vm11 = vweird.f32 %v472_v7 }
 0x1c8   :  { %v446_v8 = vpop.xlane.xlu0 %445 }
 0x1c9   :  { %v455_v9 = vmul.f32 %v453_v63, %v446_v8  ;;  %v578_v10 = vpop.eup %577 }
 0x1ca   :  { %v463_v11 = vpop.xlane.xlu1 %462  ;;  %v475_v12 = vmul.f32 %v578_v10, %v472_v7  ;;  %vm481_vm10 = vweird.f32 %v578_v10 }
 0x1cb   :  { %v467_v13 = vmul.f32 %v455_v9, %v455_v9  ;;  %v465_v15 = vmul.f32 %v463_v11, %v453_v63  ;;  %vm482_vm12 = vmor %vm480_vm11, %vm481_vm10  ;;  %v471_v16 = vsub.f32 %v440_v54, %v455_v9 }
 0x1cc   :  { %v476_v17 = vmul.f32 %v578_v10, %v475_v12 }
 0x1cd   :  { %v469_v18 = vsub.f32 %v465_v15, %v467_v13 }
 0x1ce   :  { %v477_v19 = vmul.f32 0.5, %v476_v17 }
 0x1cf   :  { %v473_v20 = vadd.f32 1e-05, %v469_v18 }
 0x1d0   :  { %v478_v22 = vsub.f32 1.5, %v477_v19 }
 0x1d1   :  { %579 = vrsqrt.f32 %v473_v20  ;;  %vm490_vm14 = vweird.f32 %v473_v20 }
 0x1d2   :  { %v479_v23 = vmul.f32 %v578_v10, %v478_v22 }
 0x1d4   :  { %v483_v26 = vsel %vm482_vm12, %v578_v10, %v479_v23 }
 0x1d5   :  { %v494_v27 = vmul.f32 %v483_v26, %v470_v24 }
 0x1d7   :  { %v580_v30 = vpop.eup %579  ;;  %v500_v31 = vmul.f32 %v569_v21, %v494_v27 }
 0x1d8   :  { %v485_v32 = vmul.f32 %v580_v30, %v473_v20  ;;  %vm491_vm13 = vweird.f32 %v580_v30 }
 0x1d9   :  { %v506_v33 = vadd.f32 %v570_v28, %v500_v31  ;;  %vm492_vm15 = vmor %vm490_vm14, %vm491_vm13 }
 0x1da   :  { %v486_v34 = vmul.f32 %v580_v30, %v485_v32 }
 0x1db   :  { %508 = vst.msk [vmem:[#allocation3] sm:$0xff] %vm255_vm0, %v506_v33 }
 0x1dc   :  { %v487_v35 = vmul.f32 0.5, %v486_v34 }
 0x1de   :  { %v488_v36 = vsub.f32 1.5, %v487_v35 }
 0x1e0   :  { %v489_v37 = vmul.f32 %v580_v30, %v488_v36 }
 0x1e2   :  { %v493_v38 = vsel %vm492_vm15, %v580_v30, %v489_v37 }
 0x1e3   :  { %v495_v39 = vmul.f32 %v493_v38, %v471_v16 }
 0x1e5   :  { %v501_v40 = vmul.f32 %v569_v21, %v495_v39 }
 0x1e7   :  { %v507_v41 = vadd.f32 %v570_v28, %v501_v40 }
 0x1e9   :  { %509 = vst.msk [vmem:[#allocation3 + $0x8] sm:$0xff] %vm255_vm0, %v507_v41 }
 0x1ea   :  { %522 = dma.vmem_to_hbm [thread:$0]  %s515_s23, 256, %s517_s25, [#allocation4], %s609_s26, %s609_s26, %s610_s2  }
 0x1eb   :  { %605 = dma.done.wait [#allocation4], 256  }
 0x1ec   :  { %606 = vsyncadd [#allocation4], 4294967040 }
 0x1ed   :  { %527 = vsyncpa [#allocation4], 1 }

</bundles_post_ra>
